<compile_context>
chip_gen: v7x
topology: tpu7x:2x2x1
jax: 0.10.0
libtpu: 0.0.40
codegen_flags: <defaults>
</compile_context>

<pallas_src>
import jax
import jax.numpy as jnp
from jax.experimental import pallas as pl
from jax.experimental.pallas import tpu as pltpu

_MIB = 1024 * 1024


def _make_ffn_kernel(acc_in_out: bool, approx_act: bool):
    """acc_in_out: output is f32 -> accumulate straight into o_ref (no scratch).
    approx_act: use EUP approximate reciprocal for sigmoid (bf16 path only)."""

    def kernel(x_ref, w1_ref, w3_ref, w2_ref, o_ref, *scratch):
        h = pl.program_id(1)
        acc_ref = o_ref if acc_in_out else scratch[0]

        @pl.when(h == 0)
        def _():
            acc_ref[...] = jnp.zeros_like(acc_ref)

        x = x_ref[...]
        # gate = x @ w1_tile, up = x @ w3_tile   (MXU, f32 accumulation)
        g = jnp.dot(x, w1_ref[...], preferred_element_type=jnp.float32)
        u = jnp.dot(x, w3_ref[...], preferred_element_type=jnp.float32)
        # silu(g) = g * sigmoid(g); exp/reciprocal run on the EUP slot so the
        # activation hides under the MXU work.  Exact sigmoid for f32 outputs.
        if approx_act:
            sig = pl.reciprocal(1.0 + jnp.exp(-g), approx=True)
        else:
            sig = jax.nn.sigmoid(g)
        act = g * sig * u

        # partial down-projection for this hidden tile, accumulated in f32
        acc_ref[...] += jnp.dot(act.astype(w2_ref.dtype), w2_ref[...],
                                preferred_element_type=jnp.float32)

        if not acc_in_out:
            @pl.when(h == pl.num_programs(1) - 1)
            def _():
                o_ref[...] = acc_ref[...].astype(o_ref.dtype)

    return kernel


def _pick_hidden_tile(hidden: int, desired: int) -> int:
    """Largest multiple of 128 that divides `hidden` and is <= desired."""
    assert hidden % 128 == 0, "hidden dim must be a multiple of 128"
    t = max(128, (min(desired, hidden) // 128) * 128)
    while hidden % t != 0:
        t -= 128
    return t


def _vmem_capacity_bytes() -> int:
    """Physical VMEM of the current TPU; conservative (v7x-sized) fallback."""
    try:
        info = pltpu.get_tpu_info()
        cap = getattr(info, "vmem_capacity_bytes", None)
        if cap:
            return int(cap)
    except Exception:
        pass
    return 64 * _MIB


def feed_forward(x, w1_t, w3_t, w2_t, *, tile_m=None, tile_h=None):
    """x: (tokens, dim); w1_t/w3_t: (dim, hidden); w2_t: (hidden, dim)."""
    M, D = x.shape
    H = w1_t.shape[1]
    assert D % 128 == 0, "model dim must be a multiple of 128"
    assert H % 128 == 0, "hidden dim must be a multiple of 128"

    xb = x.dtype.itemsize
    wb = w1_t.dtype.itemsize
    acc_in_out = (x.dtype == jnp.float32)   # f32 out: accumulate in o_ref, exact sigmoid
    approx_act = not acc_in_out
    # TODO(synk): if the f32 path is used in production, cast x/weights to bf16 in
    # the wrapper (f32 accumulation kept) to recover full-rate MXU throughput.

    # ---- generation-aware VMEM budget --------------------------------------
    vmem_cap = _vmem_capacity_bytes()
    small_vmem = vmem_cap < 100 * _MIB          # v7x class: 64 MiB per TensorCore
    if small_vmem:
        hard_cap = 52 * _MIB                    # leave ~12 MiB headroom for Mosaic
        n_cores = 2                             # v7x: 2 TCs shard the parallel m axis
    else:
        hard_cap = min(vmem_cap - 32 * _MIB, 100 * _MIB)   # 128 MiB parts: ~96 MiB
        n_cores = 1
    budget = int(hard_cap / 1.3)                # est * 1.3 must fit under hard_cap

    # sublane packing of the second-to-last dim: f32 -> 8, bf16 -> 16, int8/fp8 -> 32
    sub = 8 * max(1, 4 // xb)

    # ---- tile selection ------------------------------------------------------
    if tile_m is None:
        tile_m = 512                             # prefill: MXU-bound arithmetic intensity
    if tile_h is None:
        tile_h = 256 if small_vmem else 512      # smaller weight residency on v7x
    tile_h = _pick_hidden_tile(H, tile_h)

    tile_m = min(tile_m, M)
    if tile_m < M:
        tile_m = max(sub, (tile_m // sub) * sub)
    # else tile_m == M: a full-extent block is always legal

    def est(tm, th, nbuf):
        io = 2 * 2 * tm * D * xb                  # x + out, double-buffered
        acc = 0 if acc_in_out else tm * D * 4     # f32 accumulator scratch
        w = nbuf * (2 * D * th + th * D) * wb     # w1 + w3 + w2 tiles, nbuf-deep
        return io + acc + w

    def shrink_m(tm):
        return max(sub, ((tm // 2) // sub) * sub)

    # 3-deep weight buffering (hides DMA jitter, mainly v5e) when it can matter
    weight_bufs = 3 if (not small_vmem and H // tile_h >= 3) else 2

    # shrink until the estimate fits the per-generation budget (large-D safety)
    while est(tile_m, tile_h, weight_bufs) > budget:
        if weight_bufs > 2:
            weight_bufs = 2
        elif tile_h > 256:
            tile_h = _pick_hidden_tile(H, tile_h // 2)
        elif tile_m > 256:
            tile_m = 256
        elif tile_h > 128:
            tile_h = _pick_hidden_tile(H, tile_h // 2)
        elif tile_m > sub:
            tile_m = shrink_m(tile_m)
        else:
            break

    # v7x: make the number of m tiles a multiple of the TC count so neither core
    # idles on the tail tile (only ever decreases tile_m -> stays within budget).
    if n_cores > 1 and M > tile_m:
        n = (M + tile_m - 1) // tile_m
        if n % n_cores != 0:
            n = ((n + n_cores - 1) // n_cores) * n_cores
            per = (M + n - 1) // n
            tile_m = max(sub, ((per + sub - 1) // sub) * sub)

    n_h = H // tile_h
    grid = ((M + tile_m - 1) // tile_m, n_h)

    # Pre-block the up-projection weights into contiguous (n_h, D, tile_h) tiles
    # so each weight DMA is one contiguous block rather than D strided rows of
    # tile_h*wb bytes.  (In a real model, do this once at weight-load time.)
    w1_blk = w1_t.reshape(D, n_h, tile_h).transpose(1, 0, 2)
    w3_blk = w3_t.reshape(D, n_h, tile_h).transpose(1, 0, 2)
    # w2_t row-block tiles of a row-major (H, D) array are already contiguous.

    scratch_shapes = [] if acc_in_out else [pltpu.VMEM((tile_m, D), jnp.float32)]
    wkw = {"pipeline_mode": pl.Buffered(weight_bufs)} if weight_bufs != 2 else {}

    vmem_limit = min(max(int(est(tile_m, tile_h, weight_bufs) * 1.3), 32 * _MIB),
                     hard_cap)

    return pl.pallas_call(
        _make_ffn_kernel(acc_in_out, approx_act),
        out_shape=jax.ShapeDtypeStruct((M, D), x.dtype),
        grid_spec=pltpu.PrefetchScalarGridSpec(
            num_scalar_prefetch=0,
            grid=grid,
            in_specs=[
                pl.BlockSpec((tile_m, D), lambda m, h: (m, 0)),                   # x tokens
                pl.BlockSpec((None, D, tile_h), lambda m, h: (h, 0, 0), **wkw),   # w1 tile
                pl.BlockSpec((None, D, tile_h), lambda m, h: (h, 0, 0), **wkw),   # w3 tile
                pl.BlockSpec((tile_h, D), lambda m, h: (h, 0), **wkw),            # w2 tile
            ],
            out_specs=pl.BlockSpec((tile_m, D), lambda m, h: (m, 0)),
            scratch_shapes=scratch_shapes,
        ),
        compiler_params=pltpu.CompilerParams(
            dimension_semantics=("parallel", "arbitrary"),
            vmem_limit_bytes=vmem_limit,
        ),
    )(x, w1_blk, w3_blk, w2_t)


def llama_hidden_dim(dim, multiple_of, ffn_dim_multiplier=None):
    hidden_dim = 4 * dim
    hidden_dim = int(2 * hidden_dim / 3)
    if ffn_dim_multiplier is not None:
        hidden_dim = int(ffn_dim_multiplier * hidden_dim)
    return multiple_of * ((hidden_dim + multiple_of - 1) // multiple_of)


def _reference(x2d, w1_t, w3_t, w2_t, out_dtype):
    g = jnp.dot(x2d, w1_t, preferred_element_type=jnp.float32)
    u = jnp.dot(x2d, w3_t, preferred_element_type=jnp.float32)
    act = (g * jax.nn.sigmoid(g)) * u
    out = jnp.dot(act.astype(w2_t.dtype), w2_t, preferred_element_type=jnp.float32)
    return out.astype(out_dtype)


if __name__ == "__main__":
    # Small ModelArgs-consistent shapes: dim=128, multiple_of=128 -> hidden=384
    dim = 128
    multiple_of = 128
    hidden = llama_hidden_dim(dim, multiple_of)   # 384

    batch, seq = 2, 8
    tokens = batch * seq

    key = jax.random.PRNGKey(0)
    kx, k1, k2, k3 = jax.random.split(key, 4)

    # nn.Linear(in, out, bias=False) weight is (out, in); we keep the transposed
    # (in, out) form so kernel matmuls are x @ W.
    s_d = 1.0 / jnp.sqrt(dim)
    s_h = 1.0 / jnp.sqrt(hidden)
    x_f32 = jax.random.normal(kx, (batch, seq, dim), dtype=jnp.float32)
    w1_f32 = jax.random.uniform(k1, (dim, hidden), jnp.float32, -s_d, s_d)
    w3_f32 = jax.random.uniform(k3, (dim, hidden), jnp.float32, -s_d, s_d)
    w2_f32 = jax.random.uniform(k2, (hidden, dim), jnp.float32, -s_h, s_h)

    ok = True

    # --- bf16 weights + activations (intended production config) ---
    x_bf = x_f32.astype(jnp.bfloat16).reshape(tokens, dim)
    w1_bf, w3_bf, w2_bf = (w.astype(jnp.bfloat16) for w in (w1_f32, w3_f32, w2_f32))
    out_bf = feed_forward(x_bf, w1_bf, w3_bf, w2_bf)
    jax.block_until_ready(out_bf)
    ref_bf = _reference(x_bf, w1_bf, w3_bf, w2_bf, jnp.bfloat16)
    ok &= bool(jnp.allclose(out_bf.astype(jnp.float32), ref_bf.astype(jnp.float32),
                            atol=1e-2, rtol=1e-2))

    # --- f32 path (exact sigmoid, accumulates directly into the output block) ---
    x2d = x_f32.reshape(tokens, dim)
    out_f32 = feed_forward(x2d, w1_f32, w3_f32, w2_f32)
    jax.block_until_ready(out_f32)
    ref_f32 = _reference(x2d, w1_f32, w3_f32, w2_f32, jnp.float32)
    ok &= bool(jnp.allclose(out_f32, ref_f32, atol=1e-2, rtol=1e-2))

    assert ok, "mismatch vs reference"

    out = out_bf.reshape(batch, seq, dim)   # same (batch, seq, dim) API as the nn.Module
    jax.block_until_ready(out)
    print("KERNEL_OK")
</pallas_src>

<mosaic_0001>
module attributes {stable_mosaic.version = 11 : i64} {
  func.func @kernel(%arg0: i32, %arg1: i32, %arg2: memref<16x128xbf16, #tpu.memory_space<vmem>>, %arg3: memref<1x128x128xbf16, #tpu.memory_space<vmem>>, %arg4: memref<1x128x128xbf16, #tpu.memory_space<vmem>>, %arg5: memref<128x128xbf16, #tpu.memory_space<vmem>>, %arg6: memref<16x128xbf16, #tpu.memory_space<vmem>>, %arg7: memref<16x128xf32, #tpu.memory_space<vmem>>) attributes {dimension_semantics = [#tpu.dimension_semantics<parallel>, #tpu.dimension_semantics<arbitrary>], iteration_bounds = array<i64: 1, 3>, scalar_prefetch = 0 : i64, scratch_operands = 1 : i64, tpu.core_type = #tpu.core_type<tc>, window_params = [{transform_indices = @transform_0, window_bounds = array<i64: 16, 128>}, {transform_indices = @transform_1, window_bounds = array<i64: 1, 128, 128>}, {transform_indices = @transform_2, window_bounds = array<i64: 1, 128, 128>}, {transform_indices = @transform_3, window_bounds = array<i64: 128, 128>}, {transform_indices = @transform_4, window_bounds = array<i64: 16, 128>}]} {
    %c0_i32 = arith.constant 0 : i32
    %0 = arith.cmpi eq, %arg1, %c0_i32 : i32
    %1 = arith.extui %0 : i1 to i32
    %c0_i32_0 = arith.constant 0 : i32
    %2 = arith.cmpi ne, %1, %c0_i32_0 : i32
    scf.if %2 {
      %cst_19 = arith.constant 0.000000e+00 : f32
      %27 = vector.broadcast %cst_19 : f32 to vector<16x128xf32>
      %c0_20 = arith.constant 0 : index
      %c0_21 = arith.constant 0 : index
      %28 = vector.load %arg7[%c0_20, %c0_21] : memref<16x128xf32, #tpu.memory_space<vmem>>, vector<16x128xf32>
      tpu.vector_store %arg7[%c0_20, %c0_21], %27 {strides = array<i32>} : memref<16x128xf32, #tpu.memory_space<vmem>>, vector<16x128xf32>,
    } else {
    }
    %c0 = arith.constant 0 : index
    %c0_1 = arith.constant 0 : index
    %3 = vector.load %arg2[%c0, %c0_1] : memref<16x128xbf16, #tpu.memory_space<vmem>>, vector<16x128xbf16>
    %c0_2 = arith.constant 0 : index
    %c0_3 = arith.constant 0 : index
    %c0_4 = arith.constant 0 : index
    %4 = vector.load %arg3[%c0_2, %c0_3, %c0_4] : memref<1x128x128xbf16, #tpu.memory_space<vmem>>, vector<1x128x128xbf16>
    %5 = vector.shape_cast %4 : vector<1x128x128xbf16> to vector<128x128xbf16>
    %cst = arith.constant dense<0.000000e+00> : vector<16x128xf32>
    %6 = tpu.matmul %3, %5, %cst {dimension_numbers = #tpu.dot_dimension_numbers<[1], [0], [0], [1], [0, 0, 1, 1], [], []>} : vector<16x128xbf16>, vector<128x128xbf16>, vector<16x128xf32> -> vector<16x128xf32>
    %c0_5 = arith.constant 0 : index
    %c0_6 = arith.constant 0 : index
    %c0_7 = arith.constant 0 : index
    %7 = vector.load %arg4[%c0_5, %c0_6, %c0_7] : memref<1x128x128xbf16, #tpu.memory_space<vmem>>, vector<1x128x128xbf16>
    %8 = vector.shape_cast %7 : vector<1x128x128xbf16> to vector<128x128xbf16>
    %cst_8 = arith.constant dense<0.000000e+00> : vector<16x128xf32>
    %9 = tpu.matmul %3, %8, %cst_8 {dimension_numbers = #tpu.dot_dimension_numbers<[1], [0], [0], [1], [0, 0, 1, 1], [], []>} : vector<16x128xbf16>, vector<128x128xbf16>, vector<16x128xf32> -> vector<16x128xf32>
    %cst_9 = arith.constant 0.000000e+00 : f32
    %10 = vector.broadcast %cst_9 : f32 to vector<16x128xf32>
    %11 = arith.subf %10, %6 : vector<16x128xf32>
    %12 = math.exp %11 : vector<16x128xf32>
    %cst_10 = arith.constant 1.000000e+00 : f32
    %13 = vector.broadcast %cst_10 : f32 to vector<16x128xf32>
    %14 = arith.addf %13, %12 : vector<16x128xf32>
    %15 = tpu.reciprocal %14 {approx = true} : vector<16x128xf32> -> vector<16x128xf32>
    %16 = arith.mulf %6, %15 : vector<16x128xf32>
    %17 = arith.mulf %16, %9 : vector<16x128xf32>
    %c0_11 = arith.constant 0 : index
    %c0_12 = arith.constant 0 : index
    %18 = vector.load %arg7[%c0_11, %c0_12] : memref<16x128xf32, #tpu.memory_space<vmem>>, vector<16x128xf32>
    %19 = arith.truncf %17 : vector<16x128xf32> to vector<16x128xbf16>
    %c0_13 = arith.constant 0 : index
    %c0_14 = arith.constant 0 : index
    %20 = vector.load %arg5[%c0_13, %c0_14] : memref<128x128xbf16, #tpu.memory_space<vmem>>, vector<128x128xbf16>
    %cst_15 = arith.constant dense<0.000000e+00> : vector<16x128xf32>
    %21 = tpu.matmul %19, %20, %cst_15 {dimension_numbers = #tpu.dot_dimension_numbers<[1], [0], [0], [1], [0, 0, 1, 1], [], []>} : vector<16x128xbf16>, vector<128x128xbf16>, vector<16x128xf32> -> vector<16x128xf32>
    %22 = arith.addf %18, %21 : vector<16x128xf32>
    %c0_16 = arith.constant 0 : index
    %c0_17 = arith.constant 0 : index
    %23 = vector.load %arg7[%c0_16, %c0_17] : memref<16x128xf32, #tpu.memory_space<vmem>>, vector<16x128xf32>
    tpu.vector_store %arg7[%c0_16, %c0_17], %22 {strides = array<i32>} : memref<16x128xf32, #tpu.memory_space<vmem>>, vector<16x128xf32>,
    %c2_i32 = arith.constant 2 : i32
    %24 = arith.cmpi eq, %arg1, %c2_i32 : i32
    %25 = arith.extui %24 : i1 to i32
    %c0_i32_18 = arith.constant 0 : i32
    %26 = arith.cmpi ne, %25, %c0_i32_18 : i32
    scf.if %26 {
      %c0_19 = arith.constant 0 : index
      %c0_20 = arith.constant 0 : index
      %27 = vector.load %arg7[%c0_19, %c0_20] : memref<16x128xf32, #tpu.memory_space<vmem>>, vector<16x128xf32>
      %28 = arith.truncf %27 : vector<16x128xf32> to vector<16x128xbf16>
      %c0_21 = arith.constant 0 : index
      %c0_22 = arith.constant 0 : index
      %29 = vector.load %arg6[%c0_21, %c0_22] : memref<16x128xbf16, #tpu.memory_space<vmem>>, vector<16x128xbf16>
      tpu.vector_store %arg6[%c0_21, %c0_22], %28 {strides = array<i32>} : memref<16x128xbf16, #tpu.memory_space<vmem>>, vector<16x128xbf16>,
    } else {
    }
    return
  }
  func.func @transform_0(%arg0: i32, %arg1: i32) -> (i32, i32) {
    %c0_i32 = arith.constant 0 : i32
    %c0_i32_0 = arith.constant 0 : i32
    return %arg0, %c0_i32 : i32, i32
  }
  func.func @transform_1(%arg0: i32, %arg1: i32) -> (i32, i32, i32) {
    %c0_i32 = arith.constant 0 : i32
    %c0_i32_0 = arith.constant 0 : i32
    %c0_i32_1 = arith.constant 0 : i32
    return %arg1, %c0_i32, %c0_i32_0 : i32, i32, i32
  }
  func.func @transform_2(%arg0: i32, %arg1: i32) -> (i32, i32, i32) {
    %c0_i32 = arith.constant 0 : i32
    %c0_i32_0 = arith.constant 0 : i32
    %c0_i32_1 = arith.constant 0 : i32
    return %arg1, %c0_i32, %c0_i32_0 : i32, i32, i32
  }
  func.func @transform_3(%arg0: i32, %arg1: i32) -> (i32, i32) {
    %c0_i32 = arith.constant 0 : i32
    %c0_i32_0 = arith.constant 0 : i32
    return %arg1, %c0_i32 : i32, i32
  }
  func.func @transform_4(%arg0: i32, %arg1: i32) -> (i32, i32) {
    %c0_i32 = arith.constant 0 : i32
    %c0_i32_0 = arith.constant 0 : i32
    return %arg0, %c0_i32 : i32, i32
  }
}

</mosaic_0001>

<bundles_post_ra>
// kernel: tpu_custom_call.1
= control target key start
LH: loop header
LB: loop body
LE: loop exit
PB: predicated region body
PF: predicated region fallthrough
CT: control target
= control target key end

     0   :  { %s1684_s0 = inlined_call_operand.hbm [shape: bf16[16,128], index: 0, kind: input, shape index: {}]   ;;  %s1685_s1 = inlined_call_operand.hbm [shape: bf16[3,128,128], index: 1, kind: input, shape index: {}]   ;;  %s1686_s2 = inlined_call_operand.hbm [shape: bf16[3,128,128], index: 2, kind: input, shape index: {}]   ;;  %s1687_s3 = inlined_call_operand.hbm [shape: bf16[384,128], index: 3, kind: input, shape index: {}]   ;;  %s1688_s4 = inlined_call_operand.hbm [shape: bf16[16,128], index: 4, kind: output, shape index: {}]  }
   0x1   :  { %1701 = sst [smem:[#allocation16_spill]] %s1685_s1 }
   0x2   :  { %1702 = sst [smem:[#allocation17_spill]] %s1686_s2 }
   0x3   :  { %9 = vsyncpa [#allocation4], 0 }
   0x4   :  { %10 = vsyncpa [#allocation7], 0 }
   0x5   :  { %12 = vsyncpa [#allocation7 + $0x1], 0 }
   0x6   :  { %13 = vsyncpa [#allocation10], 0 }
   0x7   :  { %15 = vsyncpa [#allocation10 + $0x1], 0 }
   0x8   :  { %16 = vsyncpa [#allocation5], 0  ;;  %s1337_s15 = smov 0   ;;  %s1339_s16 = smov 0  }
   0x9   :  { %s1341_s17 = smov 0   ;;  %s1343_s18 = smov 0  }
   0xa   :  { %s1345_s19 = smov 0   ;;  %s1347_s20 = smov 0  }
   0xb LB: > { %s31_s21 = sadd.s32 1, %s1294_s19  ;;  %s67_s22 = sadd.s32 1, %s1286_s17  ;;  %s1298_s20 = sphi %s1347_s20, %s22_s20   ;;  %s1294_s19 = sphi %s1345_s19, %s1725_s19   ;;  %s1290_s18 = sphi %s1343_s18, %s1724_s18   ;;  %s1286_s17 = sphi %s1341_s17, %s1723_s17   ;;  %s1282_s16 = sphi %s1339_s16, %s1722_s16   ;;  %s1278_s15 = sphi %s1337_s15, %s1721_s15  }
   0xc   : > { %p32_p0 = scmp.ge.s32.totalorder %s31_s21, 3  ;;  %p74_p1 = scmp.ne.s32.totalorder %s1286_s17, %s1282_s16 }
   0xd   : > { %p75_p2 = scmp.eq.s32.totalorder %s1298_s20, 0  ;;  %p998_p5 = scmp.lt.s32.totalorder %s1298_s20, 3 }
   0xe   : > { %s1727_s21 = smov (%p32_p0, %s31_s21), 0  ;;  %s198_s25 = sand.u32 1, %s1298_s20  }
   0xf   : > { %p1374_p3 = por %p75_p2, %p74_p1  ;;  %s64_s24 = ssub.s32 %s1294_s19, %s1727_s21 }
  0x10   : > { %p65_p4 = scmp.eq.s32.totalorder %s64_s24, 0  ;;  %s1689_s26 = sand.u32 1, %s1286_s17  }
  0x11   : > { %s1388_s28 = sshll.u32 %s1689_s26, 6  ;;  %s1391_s29 = sshll.u32 %s1294_s19, 10 }
  0x12   : > { %s1384_s27 = scalar_select %p65_p4, %s1286_s17, %s67_s22  }
  0x13   : > { %s1704_s1 = sld [smem:[#allocation16_spill]]  ;;  %s202_s7 = scalar_lea.vmem [#allocation6], %s1388_s28 }
  0x14   : > { %s209_s8 = sshll.u32 %s202_s7, 4  ;;  %p1404_p6 = pnand %p998_p5, %p1374_p3  ;;  %s1400_s8 = int_to_ptr.vmem [resolvable:$true] %s209_s8 }
  0x15   : > { %s1408_s10 = scalar_lea.sflag [#allocation7], %s198_s25 }
  0x16   : > { %s1705_s9 = scalar_select %p1404_p6, 1, 0 }
  0x17   : > { %p1414_p8 = pneg %p1404_p6 }
  0x19   : > { %s1397_s6 = scalar_lea.hbm %s1704_s1, %s1391_s29  ;;  %s1097_s22 = scalar_lea.hbm %s1704_s1, 3072 }
  0x1a   : > { %s1092_s11 = scalar_lea.hbm %s1397_s6, 1024  ;;  %p1098_p11 = scmp.lt.u32.totalorder %s1397_s6, %s1704_s1 }
  0x1b   : > { %p1093_p7 = scmp.ne.s32.totalorder %s1397_s6, %s1092_s11  ;;  %p1099_p12 = scmp.lt.u32.totalorder %s1097_s22, %s1092_s11 }
  0x1c   : > { %s1706_s12 = scalar_select %p1414_p8, 1, 0 }
  0x1d   : > { %p1095_p9 = pnand %p1414_p8, %p1093_p7  ;;  %p1100_p13 = por %p1099_p12, %p1098_p11 }
  0x1e   : > { %p1101_p0 = scmp.lt.u32.totalorder %s1092_s11, %s1397_s6 }
  0x1f   : > { %p1096_p10 = pneg %p1095_p9 }
  0x20   : > { %p1102_p1 = por %p1101_p0, %p1100_p13 }
  0x22   : > { %p1103_p2 = pnand %p1102_p1, %p1096_p10 }
  0x24   : > { %1106 = shalt.err (!%p1103_p2)
}
  0x25   : > { %s1107_s25 = scalar_lea.vmem %s1400_s8, 1024  ;;  %s1300_s30 = smov [#allocation6]  }
  0x26   : > { %p1108_p3 = scmp.ne.s32.totalorder %s1400_s8, %s1107_s25  ;;  %s1112_s5 = sshll.u32 %s1300_s30, 4  ;;  %s1113_s5 = int_to_ptr.vmem [resolvable:$false] %s1112_s5 }
  0x27   : > { %s1114_s7 = scalar_lea.vmem %s1113_s5, 2048  ;;  %p1115_p7 = scmp.lt.s32.totalorder %s1400_s8, %s1113_s5 }
  0x28   : > { %p1110_p4 = pnand %p1108_p3, %p1414_p8  ;;  %p1116_p9 = scmp.lt.s32.totalorder %s1114_s7, %s1107_s25 }
  0x2a   : > { %p1111_p5 = pneg %p1110_p4  ;;  %p1117_p11 = por %p1116_p9, %p1115_p7 }
  0x2c   : > { %p1118_p12 = pnand %p1117_p11, %p1111_p5 }
  0x2e   : > { %1121 = shalt.err (!%p1118_p12)
}
  0x2f   : > { %s1690_s11 = smov 64   ;;  %s1692_s13 = smov 4  }
  0x30   : > { %990 = dma.hbm_to_vmem [thread:$0]  (!%p1404_p6), %s1397_s6, 1024, %s1400_s8, %s1408_s10, %s1690_s11, %s1690_s11, %s1692_s13  }
  0x31   : > { %s1442_s14 = sadd.s32 4294967295, %s1298_s20   ;;  %p80_p10 = scmp.ne.s32.totalorder %s1282_s16, %s1278_s15 }
  0x32   : > { %p1694_p13 = scmp.eq.s32.totalorder %s1442_s14, 0  ;;  %p822_p0 = scmp.ge.s32.totalorder %s1298_s20, 1 }
  0x33   : > { %p169_p1 = scmp.lt.s32.totalorder %s1298_s20, 4  ;;  %s1303_s6 = smov [#allocation3]  }
  0x34   : > { %p1451_p2 = por %p1694_p13, %p80_p10  ;;  %s184_s8 = sshll.u32 %s1303_s6, 4  ;;  %s1461_s8 = int_to_ptr.vmem [resolvable:$true] %s184_s8 }
  0x35   : > { %p1455_p3 = pnand %p822_p0, %p169_p1  ;;  %s1709_s2 = sld [smem:[#allocation17_spill]] }
  0x36   : > { %s1707_s22 = scalar_select %p1451_p2, 1, 0 }
  0x37   : > { %s1708_s23 = scalar_select %p1455_p3, 1, 0 }
  0x38   : > { %p983_p4 = pneg %p1455_p3  ;;  %s223_s30 = scalar_lea.vmem [#allocation8], %s1388_s28 }
  0x39   : > { %s230_s5 = sshll.u32 %s223_s30, 4  ;;  %s1476_s5 = int_to_ptr.vmem [resolvable:$true] %s230_s5 }
  0x3a   : > { %p1472_p5 = pnand %p983_p4, %p1694_p13 }
  0x3b   : > { %s1467_s25 = scalar_lea.hbm %s1709_s2, %s1391_s29  ;;  %s1127_s26 = scalar_lea.hbm %s1709_s2, 3072 }
  0x3c   : > { %s1710_s7 = scalar_select %p1472_p5, 1, 0 }
  0x3d   : > { %s1122_s6 = scalar_lea.hbm %s1467_s25, 1024  ;;  %p1128_p12 = scmp.lt.u32.totalorder %s1467_s25, %s1709_s2 }
  0x3e   : > { %p1123_p7 = scmp.ne.s32.totalorder %s1467_s25, %s1122_s6  ;;  %p1129_p10 = scmp.lt.u32.totalorder %s1127_s26, %s1122_s6 }
  0x3f   : > { %p1131_p1 = scmp.lt.u32.totalorder %s1122_s6, %s1467_s25 }
  0x40   : > { %p1125_p9 = pnand %p1123_p7, %p1414_p8  ;;  %p1130_p0 = por %p1129_p10, %p1128_p12 }
  0x42   : > { %p1126_p11 = pneg %p1125_p9  ;;  %p1132_p4 = por %p1131_p1, %p1130_p0 }
  0x44   : > { %p1133_p13 = pnand %p1132_p4, %p1126_p11 }
  0x46   : > { %1136 = shalt.err (!%p1133_p13)
}
  0x47   : > { %s1137_s30 = scalar_lea.vmem %s1476_s5, 1024  ;;  %s1304_s15 = smov [#allocation8]  }
  0x48   : > { %p1138_p7 = scmp.ne.s32.totalorder %s1476_s5, %s1137_s30  ;;  %s1142_s24 = sshll.u32 %s1304_s15, 4  ;;  %s1143_s24 = int_to_ptr.vmem [resolvable:$false] %s1142_s24 }
  0x49   : > { %s1144_s11 = scalar_lea.vmem %s1143_s24, 2048  ;;  %p1145_p3 = scmp.lt.s32.totalorder %s1476_s5, %s1143_s24 }
  0x4a   : > { %p1140_p9 = pnand %p1138_p7, %p1414_p8  ;;  %p1146_p5 = scmp.lt.s32.totalorder %s1144_s11, %s1137_s30 }
  0x4c   : > { %p1141_p2 = pneg %p1140_p9  ;;  %p1147_p12 = por %p1146_p5, %p1145_p3 }
  0x4e   : > { %p1148_p10 = pnand %p1147_p12, %p1141_p2 }
  0x50   : > { %1151 = shalt.err (!%p1148_p10)
}
  0x51   : > { %s1711_s26 = smov 4   ;;  %s1712_s13 = smov 64  }
  0x52   : > { %993 = dma.hbm_to_vmem [thread:$0]  (!%p1404_p6), %s1467_s25, 1024, %s1476_s5, %s1408_s10, %s1712_s13, %s1712_s13, %s1711_s26  }
  0x53   : > { %s1152_s15 = scalar_lea.hbm %s1684_s0, 128  ;;  %p1713_p2 = scmp.ne.s32.totalorder %s1710_s7, 0 }
  0x54   : > { %p1153_p13 = scmp.ne.s32.totalorder %s1684_s0, %s1152_s15  ;;  %p1159_p0 = scmp.lt.u32.totalorder %s1152_s15, %s1684_s0 }
  0x55   : > { %p1154_p3 = pneg %p1713_p2 }
  0x57   : > { %p1155_p5 = pnand %p1154_p3, %p1153_p13 }
  0x59   : > { %p1156_p11 = pneg %p1155_p5 }
  0x5b   : > { %p1161_p1 = pnand %p1159_p0, %p1156_p11 }
  0x5d   : > { %1164 = shalt.err (!%p1161_p1)
}
  0x5e   : > { %s1165_s10 = scalar_lea.vmem %s1461_s8, 128  ;;  %p1173_p12 = scmp.lt.s32.totalorder %s1461_s8, %s1461_s8 }
  0x5f   : > { %p1166_p4 = scmp.ne.s32.totalorder %s1461_s8, %s1165_s10  ;;  %p1174_p10 = scmp.lt.s32.totalorder %s1165_s10, %s1165_s10 }
  0x61   : > { %p1168_p7 = pnand %p1166_p4, %p1154_p3  ;;  %p1175_p6 = por %p1174_p10, %p1173_p12 }
  0x63   : > { %p1169_p9 = pneg %p1168_p7 }
  0x65   : > { %p1176_p8 = pnand %p1175_p6, %p1169_p9 }
  0x67   : > { %1179 = shalt.err (!%p1176_p8)
}
  0x68   : > { %986 = dma.hbm_to_vmem [thread:$0]  (!%p1713_p2), %s1684_s0, 128, %s1461_s8, [#allocation4], %s1712_s13, %s1712_s13, %s1711_s26  }
  0x69   : > { %s1531_s6 = scalar_lea.hbm %s1687_s3, %s1391_s29  ;;  %s244_s7 = scalar_lea.vmem [#allocation9], %s1388_s28 }
  0x6a   : > { %s251_s15 = sshll.u32 %s244_s7, 4  ;;  %s1714_s24 = sand.u32 1, %s1286_s17   ;;  %s1534_s15 = int_to_ptr.vmem [resolvable:$true] %s251_s15 }
  0x6b   : > { %s1538_s30 = scalar_lea.sflag [#allocation10], %s1714_s24  ;;  %s1180_s11 = scalar_lea.hbm %s1531_s6, 1024 }
  0x6c   : > { %p1181_p6 = scmp.ne.s32.totalorder %s1531_s6, %s1180_s11  ;;  %p1715_p8 = scmp.ne.s32.totalorder %s1706_s12, 0 }
  0x6d   : > { %s1185_s29 = scalar_lea.hbm %s1687_s3, 3072  ;;  %p1186_p3 = scmp.lt.u32.totalorder %s1531_s6, %s1687_s3 }
  0x6e   : > { %p1183_p13 = pnand %p1181_p6, %p1715_p8  ;;  %p1187_p5 = scmp.lt.u32.totalorder %s1185_s29, %s1180_s11 }
  0x6f   : > { %p1189_p0 = scmp.lt.u32.totalorder %s1180_s11, %s1531_s6 }
  0x70   : > { %p1184_p2 = pneg %p1183_p13  ;;  %p1188_p11 = por %p1187_p5, %p1186_p3 }
  0x72   : > { %p1190_p1 = por %p1189_p0, %p1188_p11 }
  0x74   : > { %p1191_p4 = pnand %p1190_p1, %p1184_p2 }
  0x76   : > { %1194 = shalt.err (!%p1191_p4)
}
  0x77   : > { %s1195_s28 = scalar_lea.vmem %s1534_s15, 1024  ;;  %s1305_s25 = smov [#allocation9]  }
  0x78   : > { %p1196_p7 = scmp.ne.s32.totalorder %s1534_s15, %s1195_s28  ;;  %s1200_s5 = sshll.u32 %s1305_s25, 4  ;;  %s1201_s5 = int_to_ptr.vmem [resolvable:$false] %s1200_s5 }
  0x79   : > { %s1202_s7 = scalar_lea.vmem %s1201_s5, 2048  ;;  %p1203_p10 = scmp.lt.s32.totalorder %s1534_s15, %s1201_s5 }
  0x7a   : > { %p1198_p9 = pnand %p1196_p7, %p1715_p8  ;;  %p1204_p6 = scmp.lt.s32.totalorder %s1202_s7, %s1195_s28 }
  0x7c   : > { %p1199_p12 = pneg %p1198_p9  ;;  %p1205_p13 = por %p1204_p6, %p1203_p10 }
  0x7e   : > { %p1206_p3 = pnand %p1205_p13, %p1199_p12 }
  0x80   : > { %1209 = shalt.err (!%p1206_p3)
}
  0x81   : > { %p1716_p2 = scmp.ne.s32.totalorder %s1705_s9, 0  ;;  %p1717_p8 = scmp.ne.s32.totalorder %s1708_s23, 0 }
  0x82   : > { %p1718_p5 = scmp.eq.s32.totalorder (!%p1717_p8), %s1442_s14, 0 }
  0x83   : > { %996 = dma.hbm_to_vmem [thread:$0]  (!%p1716_p2), %s1531_s6, 1024, %s1534_s15, %s1538_s30, %s1712_s13, %s1712_s13, %s1711_s26  }
  0x84   : > { %263 = sbr.rel (%p1717_p8) target bundleno = 691 (0x2b3), region = 36 }
  0x8b   : > { %1261 = dma.done.wait (%p1718_p5), [#allocation4], 128   ;;  %p1719_p11 = pmov %p1718_p5 }
  0x8c   : > { %s269_s9 = sand.u32 1, %s1442_s14   ;;  %s271_s12 = sand.u32 1, %s1282_s16  }
  0x8d   : > { %1263 = vsyncadd (%p1719_p11), [#allocation4], 4294967168  ;;  %s836_s24 = sshll.u32 %s271_s12, 6  ;;  %s270_s11 = scalar_lea.sflag [#allocation7], %s269_s9 }
  0x8e   : > { %s1573_s8 = scalar_lea.vmem [#allocation6], %s836_s24  ;;  %p1720_p0 = scmp.ne.s32.totalorder %s1707_s22, 0 }
  0x90   : > { %1265 = dma.done.wait (%p1720_p0), %s270_s11, 2048  }
  0x91   : > { %1267 = vsyncadd (%p1720_p0), %s270_s11, 4294965248  ;;  %s1579_s23 = scalar_lea.vmem [#allocation8], %s836_s24  ;;  %s288_s26 = scalar_lea.sflag [#allocation10], %s271_s12 }
  0x92   : > { %s1581_s13 = scalar_lea.vmem [#allocation9], %s836_s24 }
  0x93   : > { %1269 = dma.done.wait (%p1720_p0), %s288_s26, 1024  }
  0x94   : > { %1271 = vsyncadd (%p1720_p0), %s288_s26, 4294966272  ;;  %p839_p1 = scmp.ne.s32.totalorder %s1290_s18, 0 }
  0x95   : > { %v1306_v0 = vmov (!%p839_p1), 0.0  }
  0x96   : > { %328 = sbr.rel (%p839_p1) target bundleno = 157 (0x9d), region = 56  ;;  %329 = vst [vmem:[#allocation2] sm:$0xff] (!%p839_p1), %v1306_v0  ;;  %330 = vst [vmem:[#allocation2 + $0x8] sm:$0xff] (!%p839_p1), %v1306_v0 }
  0x9d PF: > { %v1059_v1 = vld [vmem:[%s1573_s8] sm:$0xff]   ;;  %v1307_v2 = vmov 0.0   ;;  %v1060_v3 = vld [vmem:[%s1573_s8 + $0x8] sm:$0xff]   ;;  %vm1308_vm0 = vmmov 0   ;;  %v1061_v4 = vld [vmem:[%s1573_s8 + $0x10] sm:$0xff]   ;;  %p865_p4 = scmp.ne.s32.totalorder %s1290_s18, 2 }
  0x9e   : > { %909 = vmatprep.subr.bf16.mxu0 %v1307_v2  ;;  %929 = vmatprep.subr.bf16.mxu1 %v1307_v2  ;;  %v1066_v5 = vld [vmem:[%s1579_s23] sm:$0xff]   ;;  %v1062_v6 = vld [vmem:[%s1573_s8 + $0x18] sm:$0xff]   ;;  %v1069_v7 = vld [vmem:[%s1579_s23 + $0x8] sm:$0xff]  }
  0x9f   : > { %910 = vmatpush3.bf16.msra.mxu0 %v1059_v1  ;;  %925 = vmatprep.mubr.msk.bf16.mxu0 %vm1308_vm0, %v1307_v2  ;;  %v1070_v8 = vld [vmem:[%s1579_s23 + $0x10] sm:$0xff]   ;;  %v1063_v9 = vld [vmem:[%s1573_s8 + $0x20] sm:$0xff]   ;;  %v1064_v10 = vld [vmem:[%s1573_s8 + $0x28] sm:$0xff]  }
  0xa0   : > { %911 = vmatprep.subr.bf16.mxu0 %v1307_v2  ;;  %945 = vmatprep.mubr.msk.bf16.mxu1 %vm1308_vm0, %v1307_v2  ;;  %v1071_v11 = vld [vmem:[%s1579_s23 + $0x18] sm:$0xff]   ;;  %v1072_v12 = vld [vmem:[%s1579_s23 + $0x20] sm:$0xff]   ;;  %v1065_v13 = vld [vmem:[%s1573_s8 + $0x30] sm:$0xff]  }
  0xa1   : > { %930 = vmatpush3.bf16.msra.mxu1 %v1066_v5  ;;  %v1073_v14 = vld [vmem:[%s1579_s23 + $0x28] sm:$0xff]   ;;  %v1067_v15 = vld [vmem:[%s1573_s8 + $0x38] sm:$0xff]   ;;  %v1074_v17 = vld [vmem:[%s1579_s23 + $0x30] sm:$0xff]  }
  0xa2   : > { %931 = vmatprep.subr.bf16.mxu1 %v1307_v2  ;;  %v1068_v16 = vld [vmem:[#allocation3] sm:$0xff]   ;;  %v1076_v19 = vld [vmem:[%s1581_s13] sm:$0xff]   ;;  %v1077_v20 = vld [vmem:[%s1581_s13 + $0x8] sm:$0xff]  }
  0xa3   : > { %912 = vmatpush3.bf16.msra.mxu0 %v1060_v3  ;;  %v1075_v18 = vld [vmem:[%s1579_s23 + $0x38] sm:$0xff]   ;;  %v1078_v21 = vld [vmem:[%s1581_s13 + $0x10] sm:$0xff]   ;;  %v1080_v23 = vld [vmem:[%s1581_s13 + $0x20] sm:$0xff]  }
  0xa4   : > { %913 = vmatprep.subr.bf16.mxu0 %v1307_v2  ;;  %v1079_v22 = vld [vmem:[%s1581_s13 + $0x18] sm:$0xff]   ;;  %v1081_v24 = vld [vmem:[%s1581_s13 + $0x28] sm:$0xff]   ;;  %v1082_v25 = vld [vmem:[%s1581_s13 + $0x30] sm:$0xff]  }
  0xa5   : > { %932 = vmatpush3.bf16.msra.mxu1 %v1069_v7  ;;  %v1083_v26 = vld [vmem:[%s1581_s13 + $0x38] sm:$0xff]   ;;  %v563_v50 = vld [vmem:[#allocation2] sm:$0xff]  ;;  %v564_v52 = vld [vmem:[#allocation2 + $0x8] sm:$0xff] }
  0xa6   : > { %933 = vmatprep.subr.bf16.mxu1 %v1307_v2 }
  0xa7   : > { %914 = vmatpush3.bf16.msra.mxu0 %v1061_v4 }
  0xa8   : > { %915 = vmatprep.subr.bf16.mxu0 %v1307_v2 }
  0xa9   : > { %934 = vmatpush3.bf16.msra.mxu1 %v1070_v8 }
  0xaa   : > { %935 = vmatprep.subr.bf16.mxu1 %v1307_v2 }
  0xab   : > { %916 = vmatpush3.bf16.msra.mxu0 %v1062_v6 }
  0xac   : > { %917 = vmatprep.subr.bf16.mxu0 %v1307_v2 }
  0xad   : > { %936 = vmatpush3.bf16.msra.mxu1 %v1071_v11 }
  0xae   : > { %937 = vmatprep.subr.bf16.mxu1 %v1307_v2 }
  0xaf   : > { %918 = vmatpush3.bf16.msra.mxu0 %v1063_v9 }
  0xb0   : > { %919 = vmatprep.subr.bf16.mxu0 %v1307_v2 }
  0xb1   : > { %938 = vmatpush3.bf16.msra.mxu1 %v1072_v12 }
  0xb2   : > { %939 = vmatprep.subr.bf16.mxu1 %v1307_v2 }
  0xb3   : > { %920 = vmatpush3.bf16.msra.mxu0 %v1064_v10 }
  0xb4   : > { %921 = vmatprep.subr.bf16.mxu0 %v1307_v2 }
  0xb5   : > { %940 = vmatpush3.bf16.msra.mxu1 %v1073_v14 }
  0xb6   : > { %941 = vmatprep.subr.bf16.mxu1 %v1307_v2 }
  0xb7   : > { %922 = vmatpush3.bf16.msra.mxu0 %v1065_v13 }
  0xb8   : > { %923 = vmatprep.subr.bf16.mxu0 %v1307_v2 }
  0xb9   : > { %942 = vmatpush3.bf16.msra.mxu1 %v1074_v17 }
  0xba   : > { %943 = vmatprep.subr.bf16.mxu1 %v1307_v2 }
  0xbb   : > { %924 = vmatpush3.bf16.msra.mxu0 %v1067_v15 }
  0xbc   : > { %949 = vmatprep.subr.bf16.mxu0 %v1307_v2 }
  0xbd   : > { %944 = vmatpush3.bf16.msra.mxu1 %v1075_v18 }
  0xbe   : > { %926 = vmatmul.mubr.bf16.vlgmr.msra.gmra.mrb[0].mxu0 %v1068_v16 }
  0xbf   : > { %965 = vmatprep.mubr.msk.bf16.mxu0 %vm1308_vm0, %v1307_v2  ;;  %950 = vmatpush3.bf16.msra.mxu0 %v1076_v19 }
  0xc0   : > { %946 = vmatmul.mubr.bf16.vlgmr.msra.gmra.mrb[0].mxu1 %v1068_v16  ;;  %951 = vmatprep.subr.bf16.mxu0 %v1307_v2 }
  0xc3   : > { %952 = vmatpush3.bf16.msra.mxu0 %v1077_v20 }
  0xc4   : > { %953 = vmatprep.subr.bf16.mxu0 %v1307_v2 }
  0xc7   : > { %954 = vmatpush3.bf16.msra.mxu0 %v1078_v21 }
  0xc8   : > { %955 = vmatprep.subr.bf16.mxu0 %v1307_v2 }
  0xcb   : > { %956 = vmatpush3.bf16.msra.mxu0 %v1079_v22 }
  0xcc   : > { %957 = vmatprep.subr.bf16.mxu0 %v1307_v2 }
  0xcf   : > { %958 = vmatpush3.bf16.msra.mxu0 %v1080_v23 }
  0xd0   : > { %959 = vmatprep.subr.bf16.mxu0 %v1307_v2 }
  0xd3   : > { %960 = vmatpush3.bf16.msra.mxu0 %v1081_v24 }
  0xd4   : > { %961 = vmatprep.subr.bf16.mxu0 %v1307_v2 }
  0xd7   : > { %962 = vmatpush3.bf16.msra.mxu0 %v1082_v25 }
  0xd8   : > { %963 = vmatprep.subr.bf16.mxu0 %v1307_v2 }
  0xdb   : > { %964 = vmatpush3.bf16.msra.mxu0 %v1083_v26 }
 0x191   : > { %v437_v27 = vpop.f32.mrb[0].mxu0 }
 0x192   : > { %v549_v28 = vsub.f32 0.0, %v437_v27  ;;  %v927_v29 = vpop.f32.mrb[1].mxu0 }
 0x193   : > { %v440_v30 = vpop.f32.mrb[2].mxu0  ;;  %v542_v35 = vpop.f32.mrb[0].mxu1 }
 0x194   : > { %v551_v31 = vmul.f32 1.442695, %v549_v28  ;;  %v550_v32 = vsub.f32 0.0, %v440_v30  ;;  %v928_v33 = vpop.f32.mrb[3].mxu0  ;;  %v947_v36 = vpop.f32.mrb[1].mxu1 }
 0x195   : > { %v545_v37 = vpop.f32.mrb[2].mxu1 }
 0x196   : > { %1084 = vpow2.f32 %v551_v31  ;;  %v553_v34 = vmul.f32 1.442695, %v550_v32  ;;  %v948_v38 = vpop.f32.mrb[3].mxu1 }
 0x198   : > { %1086 = vpow2.f32 %v553_v34 }
 0x1a0   : > { %v1085_v39 = vpop.eup %1084 }
 0x1a1   : > { %v555_v40 = vadd.f32 1.0, %v1085_v39 }
 0x1a2   : > { %v1087_v41 = vpop.eup %1086 }
 0x1a3   : > { %1088 = vrcp.f32 %v555_v40  ;;  %v556_v42 = vadd.f32 1.0, %v1087_v41 }
 0x1a5   : > { %1090 = vrcp.f32 %v556_v42 }
 0x1ad   : > { %v1089_v43 = vpop.eup %1088 }
 0x1ae   : > { %v559_v44 = vmul.f32 %v1089_v43, %v437_v27 }
 0x1af   : > { %v1091_v45 = vpop.eup %1090 }
 0x1b0   : > { %v560_v46 = vmul.f32 %v1091_v45, %v440_v30  ;;  %v561_v47 = vmul.f32 %v559_v44, %v542_v35 }
 0x1b2   : > { %v562_v48 = vmul.f32 %v560_v46, %v545_v37 }
 0x1b4   : > { %v565_v49 = vpack.c.bf16 %v562_v48, %v561_v47 }
 0x1b6   : > { %966 = vmatmul.mubr.bf16.vlgmr.msra.gmra.mrb[4].mxu0 %v565_v49 }
 0x288   : > { %678 = sbr.rel (%p865_p4) target bundleno = 665 (0x299), region = 60 }
 0x289   : > { %v664_v51 = vpop.f32.mrb[4].mxu0 }
 0x28a   : > { %v671_v53 = vadd.f32 %v664_v51, %v563_v50  ;;  %v967_v54 = vpop.f32.mrb[5].mxu0 }
 0x28b   : > { %v667_v55 = vpop.f32.mrb[6].mxu0 }
 0x28c   : > { %673 = vst [vmem:[#allocation2] sm:$0xff] %v671_v53  ;;  %v672_v56 = vadd.f32 %v667_v55, %v564_v52  ;;  %v968_v57 = vpop.f32.mrb[7].mxu0 }
 0x28e   : > { %674 = vst [vmem:[#allocation2 + $0x8] sm:$0xff] %v672_v56 }
 0x293   : > { %v679_v58 = vld [vmem:[#allocation2] sm:$0xff] }
 0x295   : > { %v680_v59 = vld [vmem:[#allocation2 + $0x8] sm:$0xff] }
 0x296   : > { %v880_v60 = vpack.c.bf16 %v680_v59, %v679_v58 }
 0x298   : > { %881 = vst [vmem:[#allocation11] sm:$0xff] %v880_v60  }
 0x299 PF: > { %p1000_p7 = scmp.eq.s32.totalorder %s1442_s14, 2  ;;  %s1309_s22 = smov [#allocation11]  }
 0x29a   : > { %s700_s6 = sshll.u32 %s1309_s22, 4  ;;  %s701_s6 = int_to_ptr.vmem [resolvable:$true] %s700_s6 }
 0x29b   : > { %s1210_s15 = scalar_lea.vmem %s701_s6, 128  ;;  %p1217_p6 = scmp.lt.s32.totalorder %s701_s6, %s701_s6 }
 0x29c   : > { %p1211_p9 = scmp.ne.s32.totalorder %s701_s6, %s1210_s15  ;;  %p1218_p13 = scmp.lt.s32.totalorder %s1210_s15, %s1210_s15 }
 0x29e   : > { %p1212_p12 = pnand %p1211_p9, %p1000_p7  ;;  %p1219_p3 = por %p1218_p13, %p1217_p6 }
 0x2a0   : > { %p1213_p10 = pneg %p1212_p12 }
 0x2a2   : > { %p1220_p2 = pnand %p1219_p3, %p1213_p10 }
 0x2a4   : > { %1223 = shalt.err (!%p1220_p2)
}
 0x2a5   : > { %s1224_s10 = scalar_lea.hbm %s1688_s4, 128 }
 0x2a6   : > { %p1225_p8 = scmp.ne.s32.totalorder %s1688_s4, %s1224_s10  ;;  %p1230_p0 = scmp.lt.u32.totalorder %s1224_s10, %s1688_s4 }
 0x2a8   : > { %p1226_p5 = pnand %p1225_p8, %p1000_p7 }
 0x2aa   : > { %p1227_p11 = pneg %p1226_p5 }
 0x2ac   : > { %p1232_p1 = pnand %p1230_p0, %p1227_p11 }
 0x2ae   : > { %1235 = shalt.err (!%p1232_p1)
}
 0x2af   : > { %s1310_s25 = smov 64   ;;  %s1311_s5 = smov 4  }
 0x2b0   : > { %980 = dma.vmem_to_hbm [thread:$0]  (%p1000_p7), %s701_s6, 128, %s1688_s4, [#allocation5], %s1310_s25, %s1310_s25, %s1311_s5  }
 0x2b1   : > { %1273 = dma.done.wait (%p1000_p7), [#allocation5], 128  }
 0x2b2   : > { %1275 = vsyncadd (%p1000_p7), [#allocation5], 4294967168 }
 0x2b3 PF: > { %s22_s20 = sadd.s32 1, %s1298_s20   ;;  %s1721_s15 = smov %s1282_s16 }
 0x2b4   : > { %p19_p4 = scmp.ge.s32.totalorder %s22_s20, 5   ;;  %s1722_s16 = smov %s1286_s17 }
 0x2b5   : > { %s1723_s17 = smov %s1384_s27  ;;  %s1724_s18 = smov %s1294_s19 }
 0x2b6   : > { %s1725_s19 = smov %s1727_s21  ;;  %21 = sbr.rel (!%p19_p4) target bundleno = 11 (0xb), region = 112 }
 0x2bd   :  { %716 = vsyncpa [#allocation4], 1 }
 0x2be   :  { %718 = vsyncpa [#allocation4 + $0x1], 1 }
 0x2bf   :  { %719 = vsyncpa [#allocation7], 1 }
 0x2c0   :  { %721 = vsyncpa [#allocation7 + $0x1], 1 }
 0x2c1   :  { %722 = vsyncpa [#allocation10], 1 }
 0x2c2   :  { %724 = vsyncpa [#allocation10 + $0x1], 1 }
 0x2c3   :  { %725 = vsyncpa [#allocation5], 1 }
 0x2c4   :  { %727 = vsyncpa [#allocation5 + $0x1], 1 }

</bundles_post_ra>
